<compile_context>
chip_gen: v6e
topology: v6e:2x2x1
jax: 0.10.0
libtpu: 0.0.40
codegen_flags: <defaults>
</compile_context>

<pallas_src>
import functools

import numpy as np
import jax
import jax.numpy as jnp
from jax import lax
from jax.experimental import pallas as pl
from jax.experimental.pallas import tpu as pltpu


def _make_posenc_kernel(C, M, tn):
    CM = C * M
    out_dim = C + 2 * CM

    def kernel(fb_ref, xT_ref, oT_ref):
        # fb_ref : (CM, 1)       f32, row r = 2^(r % M)
        # xT_ref : (C, tn)       lane-dense input block (x transposed)
        # oT_ref : (out_dim, tn) lane-dense output block (embedding transposed)
        x = xT_ref[...].astype(jnp.float32)                      # (C, tn)

        # Pass-through slab: out^T[0:C, :] = x^T.
        oT_ref[0:C, :] = x.astype(oT_ref.dtype)

        # Dense channel replication: row r of x_rep = x[r // M, :].
        # Uses only iota / compare / select (no reshapes, no integer division).
        row = lax.broadcasted_iota(jnp.int32, (CM, tn), 0)
        x_rep = jnp.broadcast_to(x[0:1, :], (CM, tn))
        for c in range(1, C):
            x_rep = jnp.where(row >= c * M,
                              jnp.broadcast_to(x[c:c + 1, :], (CM, tn)),
                              x_rep)

        freqs = x_rep * fb_ref[...]                              # (CM, tn)

        # Two coalesced slab stores (sin block, cos block).
        oT_ref[C:C + CM, :] = jnp.sin(freqs).astype(oT_ref.dtype)
        oT_ref[C + CM:C + 2 * CM, :] = jnp.cos(freqs).astype(oT_ref.dtype)

    return kernel, out_dim


def positional_encoder(x, multires, *, tn=4096, out_dtype=None,
                       transpose_output=True):
    """NeRF positional encoding matching the PyTorch PositionalEncoder.

    x: (..., C).  Returns (..., C + 2*C*multires) ordered per row as
    [x_0..x_{C-1}, sin(x_c * f_m) (c-major, m-minor), cos(...) same order].
    With transpose_output=False, returns the lane-major (out_dim, N) slab
    instead (for consumers that can contract against it directly).
    """
    C = x.shape[-1]
    M = int(multires)
    CM = C * M
    out_dtype = x.dtype if out_dtype is None else jnp.dtype(out_dtype)

    orig_shape = x.shape
    x_flat = x.reshape(-1, C)
    N = x_flat.shape[0]

    # Lane-dense layout: samples on the last (lane) axis.
    xT = x_flat.T                                                # (C, N)

    # Lane tile: multiple of 128; prefer >=2 grid steps when there is enough
    # work so the "parallel" axis shards across both TensorCores on v7x.
    n128 = ((N + 127) // 128) * 128
    tn_eff = max(128, min((int(tn) // 128) * 128, n128))
    if n128 > 128 and n128 <= tn_eff:
        tn_eff = max(128, ((n128 // 2 + 127) // 128) * 128)
    Np = ((N + tn_eff - 1) // tn_eff) * tn_eff
    if Np != N:
        xT = jnp.pad(xT, ((0, 0), (0, Np - N)))

    # Frequency column passed as a real input (fixes the captured-constant
    # error): row r -> 2^(r % M), exact powers of two.
    freq_bands = (2.0 ** np.linspace(0.0, M - 1, M)).astype(np.float32)
    fb_col = jnp.asarray(np.tile(freq_bands, C).reshape(CM, 1))

    kernel, out_dim = _make_posenc_kernel(C, M, tn_eff)
    in_itemsize = jnp.dtype(x.dtype).itemsize
    out_itemsize = jnp.dtype(out_dtype).itemsize

    outT = pl.pallas_call(
        kernel,
        out_shape=jax.ShapeDtypeStruct((out_dim, Np), out_dtype),
        grid_spec=pltpu.PrefetchScalarGridSpec(
            num_scalar_prefetch=0,
            grid=(Np // tn_eff,),
            in_specs=[
                pl.BlockSpec((CM, 1), lambda i: (0, 0)),
                pl.BlockSpec((C, tn_eff), lambda i: (0, i)),
            ],
            out_specs=pl.BlockSpec((out_dim, tn_eff), lambda i: (0, i)),
        ),
        compiler_params=pltpu.CompilerParams(
            dimension_semantics=("parallel",),
        ),
        cost_estimate=pl.CostEstimate(
            flops=2 * N * CM,
            transcendentals=2 * N * CM,
            bytes_accessed=N * C * in_itemsize + N * out_dim * out_itemsize,
        ),
    )(fb_col, xT)

    if not transpose_output:
        # Lane-major (out_dim, N) handoff: lets a consumer (e.g. the first NeRF
        # MLP matmul) contract against it directly, skipping the transpose pass.
        return outT[:, :N]

    # Layout plumbing back to the module's (..., out_dim) contract.
    # TODO(synk): when fused with a consumer kernel, use transpose_output=False
    # to eliminate this extra HBM read+write pass over the output.
    out = outT[:, :N].T
    return out.reshape(*orig_shape[:-1], out_dim)


def _reference(x, multires):
    C = x.shape[-1]
    fb = (2.0 ** jnp.linspace(0.0, multires - 1, multires)).astype(jnp.float32)
    xf = x.reshape(-1, C).astype(jnp.float32)
    freqs = xf[:, :, None] * fb[None, None, :]
    s = jnp.sin(freqs).reshape(xf.shape[0], -1)
    c = jnp.cos(freqs).reshape(xf.shape[0], -1)
    emb = jnp.concatenate([xf, s, c], axis=-1)
    return emb.reshape(*x.shape[:-1], C + 2 * C * multires).astype(x.dtype)


if __name__ == "__main__":
    multires = 4
    C = 4
    key = jax.random.PRNGKey(0)
    # (batch=2, spatial=16, channels=4): the PyTorch forward flattens to
    # (-1, C) with C as the last dim.
    x = jax.random.normal(key, (2, 16, C), dtype=jnp.float32)

    posenc = jax.jit(functools.partial(positional_encoder, multires=multires))
    out = jax.block_until_ready(posenc(x))

    ref = _reference(x, multires)
    assert out.shape == (2, 16, C + 2 * C * multires), out.shape
    assert jnp.allclose(out, ref, atol=1e-5, rtol=1e-5), "mismatch vs reference"

    print("KERNEL_OK")
</pallas_src>

<mosaic_0001>
module attributes {stable_mosaic.version = 11 : i64} {
  func.func @kernel(%arg0: i32, %arg1: memref<16x1xf32, #tpu.memory_space<vmem>>, %arg2: memref<4x128xf32, #tpu.memory_space<vmem>>, %arg3: memref<36x128xf32, #tpu.memory_space<vmem>>) attributes {dimension_semantics = [#tpu.dimension_semantics<parallel>], iteration_bounds = array<i64: 1>, scalar_prefetch = 0 : i64, scratch_operands = 0 : i64, tpu.core_type = #tpu.core_type<tc>, window_params = [{pipeline_mode = #tpu.pipeline_mode<synchronous>, transform_indices = @transform_0, window_bounds = array<i64: 16, 1>}, {transform_indices = @transform_1, window_bounds = array<i64: 4, 128>}, {transform_indices = @transform_2, window_bounds = array<i64: 36, 128>}]} {
    %c0 = arith.constant 0 : index
    %c0_0 = arith.constant 0 : index
    %0 = vector.load %arg2[%c0, %c0_0] : memref<4x128xf32, #tpu.memory_space<vmem>>, vector<4x128xf32>
    %c0_1 = arith.constant 0 : index
    %c0_2 = arith.constant 0 : index
    %1 = vector.load %arg3[%c0_1, %c0_2] : memref<36x128xf32, #tpu.memory_space<vmem>>, vector<4x128xf32>
    tpu.vector_store %arg3[%c0_1, %c0_2], %0 {strides = array<i32>} : memref<36x128xf32, #tpu.memory_space<vmem>>, vector<4x128xf32>,
    %2 = tpu.iota {dimensions = array<i32: 0>} : vector<16x128xi32>
    %3 = vector.extract_strided_slice %0 {offsets = [0, 0], sizes = [1, 128], strides = [1, 1]} : vector<4x128xf32> to vector<1x128xf32>
    %4 = vector.shape_cast %3 : vector<1x128xf32> to vector<1x128xf32>
    %5 = vector.broadcast %4 : vector<1x128xf32> to vector<16x128xf32>
    %c4_i32 = arith.constant 4 : i32
    %6 = vector.broadcast %c4_i32 : i32 to vector<16x128xi32>
    %7 = arith.cmpi sge, %2, %6 : vector<16x128xi32>
    %8 = vector.extract_strided_slice %0 {offsets = [1, 0], sizes = [1, 128], strides = [1, 1]} : vector<4x128xf32> to vector<1x128xf32>
    %9 = vector.shape_cast %8 : vector<1x128xf32> to vector<1x128xf32>
    %10 = vector.broadcast %9 : vector<1x128xf32> to vector<16x128xf32>
    %11 = arith.select %7, %10, %5 : vector<16x128xi1>, vector<16x128xf32>
    %c8_i32 = arith.constant 8 : i32
    %12 = vector.broadcast %c8_i32 : i32 to vector<16x128xi32>
    %13 = arith.cmpi sge, %2, %12 : vector<16x128xi32>
    %14 = vector.extract_strided_slice %0 {offsets = [2, 0], sizes = [1, 128], strides = [1, 1]} : vector<4x128xf32> to vector<1x128xf32>
    %15 = vector.shape_cast %14 : vector<1x128xf32> to vector<1x128xf32>
    %16 = vector.broadcast %15 : vector<1x128xf32> to vector<16x128xf32>
    %17 = arith.select %13, %16, %11 : vector<16x128xi1>, vector<16x128xf32>
    %c12_i32 = arith.constant 12 : i32
    %18 = vector.broadcast %c12_i32 : i32 to vector<16x128xi32>
    %19 = arith.cmpi sge, %2, %18 : vector<16x128xi32>
    %20 = vector.extract_strided_slice %0 {offsets = [3, 0], sizes = [1, 128], strides = [1, 1]} : vector<4x128xf32> to vector<1x128xf32>
    %21 = vector.shape_cast %20 : vector<1x128xf32> to vector<1x128xf32>
    %22 = vector.broadcast %21 : vector<1x128xf32> to vector<16x128xf32>
    %23 = arith.select %19, %22, %17 : vector<16x128xi1>, vector<16x128xf32>
    %c0_3 = arith.constant 0 : index
    %c0_4 = arith.constant 0 : index
    %24 = vector.load %arg1[%c0_3, %c0_4] : memref<16x1xf32, #tpu.memory_space<vmem>>, vector<16x1xf32>
    %25 = vector.broadcast %24 : vector<16x1xf32> to vector<16x128xf32>
    %26 = arith.mulf %23, %25 : vector<16x128xf32>
    %27 = math.sin %26 : vector<16x128xf32>
    %c4 = arith.constant 4 : index
    %c0_5 = arith.constant 0 : index
    %28 = vector.load %arg3[%c4, %c0_5] : memref<36x128xf32, #tpu.memory_space<vmem>>, vector<16x128xf32>
    tpu.vector_store %arg3[%c4, %c0_5], %27 {strides = array<i32>} : memref<36x128xf32, #tpu.memory_space<vmem>>, vector<16x128xf32>,
    %29 = math.cos %26 : vector<16x128xf32>
    %c20 = arith.constant 20 : index
    %c0_6 = arith.constant 0 : index
    %30 = vector.load %arg3[%c20, %c0_6] : memref<36x128xf32, #tpu.memory_space<vmem>>, vector<16x128xf32>
    tpu.vector_store %arg3[%c20, %c0_6], %29 {strides = array<i32>} : memref<36x128xf32, #tpu.memory_space<vmem>>, vector<16x128xf32>,
    return
  }
  func.func @transform_0(%arg0: i32) -> (i32, i32) {
    %c0_i32 = arith.constant 0 : i32
    %c0_i32_0 = arith.constant 0 : i32
    %c0_i32_1 = arith.constant 0 : i32
    return %c0_i32, %c0_i32_0 : i32, i32
  }
  func.func @transform_1(%arg0: i32) -> (i32, i32) {
    %c0_i32 = arith.constant 0 : i32
    %c0_i32_0 = arith.constant 0 : i32
    return %c0_i32, %arg0 : i32, i32
  }
  func.func @transform_2(%arg0: i32) -> (i32, i32) {
    %c0_i32 = arith.constant 0 : i32
    %c0_i32_0 = arith.constant 0 : i32
    return %c0_i32, %arg0 : i32, i32
  }
}

</mosaic_0001>

<bundles_post_ra>
// kernel: positional_encoder.1
= control target key start
LH: loop header
LB: loop body
LE: loop exit
PB: predicated region body
PF: predicated region fallthrough
CT: control target
= control target key end

     0   :  { %v520_v0 = vmov 0   ;;  %v13_v4 = vlaneseq  ;;  %v521_v37 = vmov 683565275   ;;  %v522_v41 = vmov 2475754826   ;;  %s626_s0 = inlined_call_operand.vmem [shape: f32[16,1], index: 0, kind: input, shape index: {}]   ;;  %s627_s1 = inlined_call_operand.vmem [shape: f32[4,128], index: 1, kind: input, shape index: {}]   ;;  %s628_s2 = inlined_call_operand.vmem [shape: f32[36,128], index: 2, kind: output, shape index: {}]  }
   0x1   :  { %511 = vset.pattern.permute.xlu0 %v520_v0  ;;  %v44_v1 = vld [vmem:[%s626_s0] sm:$0xff]  ;;  %v45_v3 = vld [vmem:[%s626_s0 + $0x8] sm:$0xff]  ;;  %v523_v43 = vmov 2131351028   ;;  %v524_v45 = vmov 2102212464  }
   0x2   :  { %v11_v2 = vld [vmem:[%s627_s1] sm:$0xf]  ;;  %48 = vperm.xlu0 %511, %v44_v1   ;;  %v14_v5 = vshrl.u32 %v13_v4, 7  ;;  %v525_v47 = vmov 920167782  }
   0x3   :  { %12 = vst [vmem:[%s628_s2] sm:$0xf] %v11_v2  ;;  %v526_v54 = vmov 1326507024  }
   0x4   :  { %v18_v6 = vsub.s32 0, %v14_v5  ;;  %v24_v7 = vsub.s32 1, %v14_v5  ;;  %v32_v10 = vsub.s32 2, %v14_v5  ;;  %v40_v11 = vsub.s32 3, %v14_v5 }
   0x5   :  { %vm20_vm0 = vcmp.ge.s32.totalorder %v14_v5, 4  ;;  %v15_v12 = vadd.s32 8, %v14_v5 }
   0x6   :  { %53 = vperm.xlu0 %511, %v45_v3   ;;  %v19_v8 = vrot.slane %v11_v2, %v18_v6  ;;  %v25_v9 = vrot.slane %v11_v2, %v24_v7  ;;  %v33_v14 = vrot.slane %v11_v2, %v32_v10  ;;  %v41_v15 = vrot.slane %v11_v2, %v40_v11 }
   0x7   :  { %vm37_vm1 = vcmp.ge.s32.totalorder %v15_v12, 12 }
   0x8   :  { %v26_v13 = vsel %vm20_vm0, %v25_v9, %v19_v8  ;;  %v43_v18 = vsel %vm37_vm1, %v41_v15, %v33_v14 }
  0x7d   :  { %v49_v16 = vpop.permute.xlu0 %48 }
  0x7e   :  { %v554_v17 = vmul.f32 %v49_v16, %v26_v13 }
  0x80   :  { %v58_v19 = vand.u32 2147483647, %v554_v17  ;;  %v61_v20 = vand.u32 2139095040, %v554_v17  ;;  %vm60_vm0 = vcmp.lt.s32.totalorder %v554_v17, 0 }
  0x81   :  { %v54_v21 = vpop.permute.xlu0 %53 }
  0x82   :  { %v62_v22 = vshrl.u32 %v61_v20, 23  ;;  %v558_v23 = vmul.f32 %v54_v21, %v43_v18  ;;  %v65_v24 = vand.u32 8388607, %v58_v19  ;;  %vm59_vm1 = vcmp.le.f32.partialorder %v58_v19, 0.7853982 }
  0x84   :  { %v480_v25 = vadd.s32 4294967169, %v62_v22  ;;  %v165_v26 = vand.u32 2139095040, %v558_v23  ;;  %v66_v28 = vor.u32 8388608, %v65_v24  ;;  %v162_v30 = vand.u32 2147483647, %v558_v23 }
  0x86   :  { %v68_v27 = vadd.s32 1, %v480_v25  ;;  %v166_v29 = vshrl.u32 %v165_v26, 23  ;;  %v564_v35 = vshll.u32 %v66_v28, 8  ;;  %v169_v39 = vand.u32 8388607, %v162_v30 }
  0x88   :  { %vm69_vm2 = vcmp.gt.s32.totalorder %v68_v27, 0  ;;  %v484_v32 = vadd.s32 4294967169, %v166_v29  ;;  %v170_v5 = vor.u32 8388608, %v169_v39 }
  0x89   :  { %v70_v31 = vsel %vm69_vm2, %v68_v27, 0  ;;  %vm164_vm2 = vcmp.lt.s32.totalorder %v558_v23, 0 }
  0x8a   :  { %v71_v33 = vshrl.u32 %v70_v31, 5  ;;  %v72_v34 = vand.u32 31, %v70_v31  ;;  %v172_v40 = vadd.s32 1, %v484_v32  ;;  %v210_v20 = vshll.u32 %v170_v5, 8 }
  0x8c   :  { %v73_v36 = vsub.s32 32, %v72_v34  ;;  %v75_v38 = vshll.u32 %v521_v37, %v72_v34  ;;  %v78_v42 = vshll.u32 %v522_v41, %v72_v34  ;;  %v81_v44 = vshll.u32 %v523_v43, %v72_v34 }
  0x8d   :  { %v84_v46 = vshll.u32 %v524_v45, %v72_v34  ;;  %v87_v48 = vshll.u32 %v525_v47, %v72_v34  ;;  %vm90_vm3 = vcmp.lt.s32.totalorder %v71_v33, 1  ;;  %vm92_vm4 = vcmp.lt.s32.totalorder %v71_v33, 3 }
  0x8e   :  { %v76_v49 = vshrl.u32 %v522_v41, %v73_v36  ;;  %v79_v50 = vshrl.u32 %v523_v43, %v73_v36  ;;  %v82_v51 = vshrl.u32 %v524_v45, %v73_v36  ;;  %v74_v52 = vshrl.u32 %v521_v37, %v73_v36 }
  0x8f   :  { %v85_v53 = vshrl.u32 %v525_v47, %v73_v36  ;;  %v88_v55 = vshrl.u32 %v526_v54, %v73_v36  ;;  %vm173_vm5 = vcmp.gt.s32.totalorder %v172_v40, 0  ;;  %vm93_vm6 = vcmp.lt.s32.totalorder %v71_v33, 4 }
  0x90   :  { %v77_v56 = vor.u32 %v76_v49, %v75_v38  ;;  %v80_v57 = vor.u32 %v79_v50, %v78_v42  ;;  %v83_v58 = vor.u32 %v82_v51, %v81_v44  ;;  %v174_v61 = vsel %vm173_vm5, %v172_v40, 0 }
  0x91   :  { %v86_v59 = vor.u32 %v85_v53, %v84_v46  ;;  %v89_v60 = vor.u32 %v88_v55, %v87_v48  ;;  %vm91_vm7 = vcmp.lt.s32.totalorder %v71_v33, 2  ;;  %v176_v8 = vand.u32 31, %v174_v61 }
  0x92   :  { %v94_v62 = vsel %vm90_vm3, %v74_v52, %v77_v56  ;;  %v95_v63 = vsel %vm93_vm6, %v83_v58, 2102212464  ;;  %v98_v0 = vsel %vm90_vm3, %v77_v56, %v80_v57  ;;  %v102_v1 = vsel %vm90_vm3, %v80_v57, %v83_v58 }
  0x93   :  { %v96_v2 = vsel %vm92_vm4, %v80_v57, %v95_v63  ;;  %v99_v3 = vsel %vm93_vm6, %v86_v59, 920167782  ;;  %v103_v4 = vsel %vm93_vm6, %v89_v60, 1326507024  ;;  %v175_v16 = vshrl.u32 %v174_v61, 5 }
  0x94   :  { %v100_v6 = vsel %vm92_vm4, %v83_v58, %v99_v3  ;;  %v104_v7 = vsel %vm92_vm4, %v86_v59, %v103_v4  ;;  %v97_v9 = vsel %vm91_vm7, %v94_v62, %v96_v2  ;;  %v177_v18 = vsub.s32 32, %v176_v8 }
  0x95   :  { %v101_v10 = vsel %vm91_vm7, %v98_v0, %v100_v6  ;;  %v105_v11 = vsel %vm91_vm7, %v102_v1, %v104_v7  ;;  %v113_v21 = vmul.u32 %v564_v35, %v97_v9  ;;  %v179_v22 = vshll.u32 %v521_v37, %v176_v8 }
  0x96   :  { %v577_v12 = vmul.u32.u64.low %v564_v35, %v105_v11  ;;  %v578_v13 = vmul.u32.u64.high %v564_v35, %v105_v11, %v577_v12  ;;  %v581_v14 = vmul.u32.u64.low %v564_v35, %v101_v10  ;;  %v582_v15 = vmul.u32.u64.high %v564_v35, %v101_v10, %v581_v14 }
  0x97   :  { %v182_v24 = vshll.u32 %v522_v41, %v176_v8  ;;  %v185_v25 = vshll.u32 %v523_v43, %v176_v8  ;;  %v180_v26 = vshrl.u32 %v522_v41, %v177_v18  ;;  %v183_v27 = vshrl.u32 %v523_v43, %v177_v18 }
  0x98   :  { %v186_v28 = vshrl.u32 %v524_v45, %v177_v18  ;;  %v188_v29 = vshll.u32 %v524_v45, %v176_v8  ;;  %vm115_vm8 = vc.u32 %v578_v13, %v581_v14  ;;  %v116_v31 = vadd.s32 1, %v582_v15 }
  0x99   :  { %v189_v32 = vshrl.u32 %v525_v47, %v177_v18  ;;  %v191_v33 = vshll.u32 %v525_v47, %v176_v8  ;;  %v181_v34 = vor.u32 %v180_v26, %v179_v22  ;;  %v184_v36 = vor.u32 %v183_v27, %v182_v24 }
  0x9a   :  { %v187_v38 = vor.u32 %v186_v28, %v185_v25  ;;  %v192_v39 = vshrl.u32 %v526_v54, %v177_v18  ;;  %v117_v35 = vsel %vm115_vm8, %v116_v31, %v582_v15  ;;  %vm194_vm9 = vcmp.lt.s32.totalorder %v175_v16, 1 }
  0x9b   :  { %v190_v40 = vor.u32 %v189_v32, %v188_v29  ;;  %vm197_vm10 = vcmp.lt.s32.totalorder %v175_v16, 4  ;;  %v118_v41 = vadd.s32 %v117_v35, %v113_v21  ;;  %vm196_vm11 = vcmp.lt.s32.totalorder %v175_v16, 3 }
  0x9c   :  { %v193_v42 = vor.u32 %v192_v39, %v191_v33  ;;  %v199_v43 = vsel %vm197_vm10, %v187_v38, 2102212464  ;;  %v178_v44 = vshrl.u32 %v521_v37, %v177_v18  ;;  %v202_v45 = vsel %vm194_vm9, %v181_v34, %v184_v36 }
  0x9d   :  { %v203_v46 = vsel %vm197_vm10, %v190_v40, 920167782  ;;  %v206_v48 = vsel %vm194_vm9, %v184_v36, %v187_v38  ;;  %v119_v49 = vadd.s32 536870912, %v118_v41  ;;  %vm195_vm12 = vcmp.lt.s32.totalorder %v175_v16, 2 }
  0x9e   :  { %v204_v47 = vsel %vm196_vm11, %v187_v38, %v203_v46  ;;  %v207_v50 = vsel %vm197_vm10, %v193_v42, 1326507024  ;;  %v198_v51 = vsel %vm194_vm9, %v178_v44, %v181_v34  ;;  %v200_v52 = vsel %vm196_vm11, %v184_v36, %v199_v43 }
  0x9f   :  { %v205_v53 = vsel %vm195_vm12, %v202_v45, %v204_v47  ;;  %v208_v54 = vsel %vm196_vm11, %v190_v40, %v207_v50  ;;  %v120_v55 = vshrl.u32 %v119_v49, 30  ;;  %v201_v61 = vsel %vm195_vm12, %v198_v51, %v200_v52 }
  0xa0   :  { %v209_v56 = vsel %vm195_vm12, %v206_v48, %v208_v54  ;;  %v592_v57 = vmul.u32.u64.low %v210_v20, %v205_v53  ;;  %v593_v58 = vmul.u32.u64.high %v210_v20, %v205_v53, %v592_v57  ;;  %v217_v0 = vmul.u32 %v210_v20, %v201_v61 }
  0xa1   :  { %v595_v59 = vmul.u32.u64.low %v210_v20, %v209_v56  ;;  %v596_v60 = vmul.u32.u64.high %v210_v20, %v209_v56, %v595_v59  ;;  %v121_v37 = vshll.u32 %v120_v55, 30  ;;  %v114_v12 = vadd.s32 %v581_v14, %v578_v13 }
  0xa2   :  { %v220_v63 = vadd.s32 1, %v593_v58  ;;  %v144_v39 = vsub.s32 4, %v120_v55  ;;  %vm163_vm3 = vcmp.le.f32.partialorder %v162_v30, 0.7853982  ;;  %vm150_vm10 = vweird.f32 %v554_v17 }
  0xa3   :  { %v122_v62 = vsub.s32 %v118_v41, %v121_v37  ;;  %vm219_vm13 = vc.u32 %v596_v60, %v592_v57  ;;  %v218_v36 = vadd.s32 %v592_v57, %v596_v60 }
  0xa4   :  { %v221_v2 = vsel %vm219_vm13, %v220_v63, %v593_v58  ;;  %v145_v46 = vsel %vm60_vm0, %v144_v39, %v120_v55 }
  0xa5   :  { %v124_v1 = vsub.s32 0, %v122_v62  ;;  %v222_v3 = vadd.s32 %v221_v2, %v217_v0  ;;  %v147_v50 = vsel %vm59_vm1, 0, %v145_v46 }
  0xa6   :  { %v151_v52 = vadd.s32 3, %v147_v50  ;;  %v361_v58 = vand.u32 3, %v147_v50 }
  0xa7   :  { %v481_v4 = vmin.u32 %v124_v1, %v122_v62  ;;  %v223_v5 = vadd.s32 536870912, %v222_v3 }
  0xa8   :  { %v152_v57 = vand.u32 3, %v151_v52  ;;  %vm366_vm5 = vcmp.eq.s32.totalorder %v361_v58, 2  ;;  %vm363_vm7 = vcmp.eq.s32.totalorder %v361_v58, 0  ;;  %vm362_vm9 = vcmp.lt.s32.totalorder %v361_v58, 2 }
  0xa9   :  { %v126_v6 = vclz %v481_v4  ;;  %v224_v7 = vshrl.u32 %v223_v5, 30 }
  0xaa   :  { %vm157_vm4 = vcmp.eq.s32.totalorder %v152_v57, 2  ;;  %vm154_vm6 = vcmp.eq.s32.totalorder %v152_v57, 0  ;;  %vm153_vm8 = vcmp.lt.s32.totalorder %v152_v57, 2 }
  0xab   :  { %v482_v8 = vadd.s32 4294967294, %v126_v6  ;;  %v225_v9 = vshll.u32 %v224_v7, 30  ;;  %v248_v54 = vsub.s32 4, %v224_v7 }
  0xad   :  { %vm483_vm14 = vcmp.lt.s32.totalorder %v482_v8, 0  ;;  %v226_v11 = vsub.s32 %v222_v3, %v225_v9  ;;  %v249_v55 = vsel %vm164_vm2, %v248_v54, %v224_v7 }
  0xae   :  { %v129_v10 = vsel %vm483_vm14, 0, %v482_v8 }
  0xaf   :  { %v130_v15 = vsub.s32 32, %v129_v10  ;;  %v134_v16 = vsub.s32 4294967266, %v129_v10  ;;  %v228_v18 = vsub.s32 0, %v226_v11  ;;  %v131_v20 = vshll.u32 %v122_v62, %v129_v10 }
  0xb0   :  { %v251_v62 = vsel %vm163_vm3, 0, %v249_v55 }
  0xb1   :  { %v132_v21 = vshrl.u32 %v114_v12, %v130_v15  ;;  %v135_v22 = vadd.s32 127, %v134_v16  ;;  %v485_v24 = vmin.u32 %v228_v18, %v226_v11  ;;  %v255_v4 = vadd.s32 3, %v251_v62 }
  0xb2   :  { %v464_v8 = vand.u32 3, %v251_v62 }
  0xb3   :  { %v133_v25 = vor.u32 %v132_v21, %v131_v20  ;;  %v136_v26 = vshll.u32 %v135_v22, 23  ;;  %v230_v27 = vclz %v485_v24  ;;  %v256_v7 = vand.u32 3, %v255_v4 }
  0xb4   :  { %vm469_vm12 = vcmp.eq.s32.totalorder %v464_v8, 2  ;;  %vm466_vm14 = vcmp.eq.s32.totalorder %v464_v8, 0 }
  0xb5   :  { %v137_v28 = vor.u32 4788187, %v136_v26  ;;  %v486_v29 = vadd.s32 4294967294, %v230_v27  ;;  %v140_v32 = vcvt.s32.f32 %v133_v25  ;;  %vm261_vm11 = vcmp.eq.s32.totalorder %v256_v7, 2 }
  0xb6   :  { %vm258_vm13 = vcmp.eq.s32.totalorder %v256_v7, 0 }
  0xb7   :  { %v138_v31 = vand.u32 2147483647, %v137_v28  ;;  %vm487_vm15 = vcmp.lt.s32.totalorder %v486_v29, 0 }
  0xb8   :  { %v233_v34 = vsel %vm487_vm15, 0, %v486_v29  ;;  %vm257_vm15 = vcmp.lt.s32.totalorder %v256_v7, 2 }
  0xb9   :  { %v141_v33 = vmul.f32 %v140_v32, %v138_v31  ;;  %v234_v13 = vsub.s32 32, %v233_v34  ;;  %v238_v14 = vsub.s32 4294967266, %v233_v34  ;;  %v235_v35 = vshll.u32 %v226_v11, %v233_v34 }
  0xbb   :  { %v142_v38 = vxor.u32 2147483648, %v141_v33  ;;  %v236_v40 = vshrl.u32 %v218_v36, %v234_v13  ;;  %v239_v41 = vadd.s32 127, %v238_v14 }
  0xbd   :  { %v143_v42 = vsel %vm60_vm0, %v142_v38, %v141_v33  ;;  %v237_v44 = vor.u32 %v236_v40, %v235_v35  ;;  %v240_v45 = vshll.u32 %v239_v41, 23  ;;  %vm465_vm0 = vcmp.lt.s32.totalorder %v464_v8, 2 }
  0xbe   :  { %v146_v43 = vsel %vm59_vm1, %v554_v17, %v143_v42  ;;  %vm254_vm1 = vweird.f32 %v558_v23 }
  0xbf   :  { %512 = vcosq.f32 %v146_v43  ;;  %v241_v48 = vor.u32 4788187, %v240_v45  ;;  %v244_v47 = vcvt.s32.f32 %v237_v44 }
  0xc0   :  { %514 = vsinq.f32 %v146_v43 }
  0xc1   :  { %v242_v49 = vand.u32 2147483647, %v241_v48 }
  0xc3   :  { %v245_v51 = vmul.f32 %v244_v47, %v242_v49 }
  0xc5   :  { %v246_v53 = vxor.u32 2147483648, %v245_v51 }
  0xc7   :  { %v247_v19 = vsel %vm164_vm2, %v246_v53, %v245_v51 }
  0xc8   :  { %v250_v56 = vsel %vm163_vm3, %v558_v23, %v247_v19 }
  0xc9   :  { %516 = vcosq.f32 %v250_v56 }
  0xca   :  { %518 = vsinq.f32 %v250_v56 }
  0xcc   :  { %v513_v59 = vpop.eup %512 }
  0xcd   :  { %v515_v60 = vpop.eup %514  ;;  %v158_v37 = vxor.u32 2147483648, %v513_v59 }
  0xce   :  { %v155_v61 = vxor.u32 2147483648, %v515_v60 }
  0xcf   :  { %v159_v63 = vsel %vm157_vm4, %v158_v37, %v515_v60  ;;  %v368_v0 = vsel %vm366_vm5, %v158_v37, %v515_v60 }
  0xd0   :  { %v156_v30 = vsel %vm154_vm6, %v513_v59, %v155_v61  ;;  %v365_v1 = vsel %vm363_vm7, %v513_v59, %v155_v61 }
  0xd1   :  { %v160_v2 = vsel %vm153_vm8, %v156_v30, %v159_v63  ;;  %v369_v3 = vsel %vm362_vm9, %v365_v1, %v368_v0 }
  0xd2   :  { %v161_v5 = vsel %vm150_vm10, nan, %v160_v2  ;;  %v370_v6 = vsel %vm150_vm10, nan, %v369_v3 }
  0xd3   :  { %266 = vst [vmem:[%s628_s2 + $0x4] sm:$0xff] %v161_v5  ;;  %474 = vst [vmem:[%s628_s2 + $0x14] sm:$0xff] %v370_v6 }
  0xd6   :  { %v517_v9 = vpop.eup %516 }
  0xd7   :  { %v519_v10 = vpop.eup %518  ;;  %v262_v11 = vxor.u32 2147483648, %v517_v9 }
  0xd8   :  { %v259_v12 = vxor.u32 2147483648, %v519_v10 }
  0xd9   :  { %v263_v17 = vsel %vm261_vm11, %v262_v11, %v519_v10  ;;  %v471_v15 = vsel %vm469_vm12, %v262_v11, %v519_v10 }
  0xda   :  { %v260_v16 = vsel %vm258_vm13, %v517_v9, %v259_v12  ;;  %v468_v18 = vsel %vm466_vm14, %v517_v9, %v259_v12 }
  0xdb   :  { %v264_v20 = vsel %vm257_vm15, %v260_v16, %v263_v17  ;;  %v472_v21 = vsel %vm465_vm0, %v468_v18, %v471_v15 }
  0xdc   :  { %v265_v22 = vsel %vm254_vm1, nan, %v264_v20  ;;  %v473_v24 = vsel %vm254_vm1, nan, %v472_v21 }
  0xdd   :  { %267 = vst [vmem:[%s628_s2 + $0xc] sm:$0xff] %v265_v22  ;;  %475 = vst [vmem:[%s628_s2 + $0x1c] sm:$0xff] %v473_v24 }

</bundles_post_ra>
